<compile_context>
chip_gen: v6e
topology: v6e:2x2x1
jax: 0.10.0
libtpu: 0.0.40
codegen_flags: <defaults>
</compile_context>

<pallas_src>
import functools
import math

import jax
import jax.numpy as jnp
from jax import lax
from jax.experimental import pallas as pl
from jax.experimental.pallas import tpu as pltpu

# ----------------------------- model config ---------------------------------
STATE_DIM = 16
EMBED_DIM = 32
NUM_HEADS = 4
HIDDEN_DIMS = [32]          # single hidden layer -> layers: Lin+ReLU, Lin
ACTION_DIM = 8
SEQ = 8
BATCH = 2

HEAD_DIM = EMBED_DIM // NUM_HEADS


# ------------------------------- kernel -------------------------------------
def mlp_attn_kernel(
    x_ref,        # [BS, state_dim]
    w_qkv_ref,    # [state_dim, 3E]   (embedding fused into packed q|k|v proj)
    b_qkv_ref,    # [1, 3E]
    w_h1_ref,     # [E, H1]           (attn out-proj fused into MLP layer 1)
    b_h1_ref,     # [1, H1]
    w2_ref,       # [H1, A]
    b2_ref,       # [1, A]
    mask_ref,     # [BS, H*BS]        additive cross-batch mask (0 / -1e30)
    const_ref,    # [H*BS, E + H*BS]  = [head_mask | ones_blockdiag]
    y_ref,        # [BS, A]
    attw_ref,     # [BS, S]
    *,
    batch,
    seq,
):
    bs = batch * seq
    scale = 1.0 / math.sqrt(HEAD_DIM)

    x = x_ref[...]                                          # [BS, state_dim]

    # --- fused embedding + qkv projection (one MXU pass) ---
    qkv = jnp.dot(x, w_qkv_ref[...], preferred_element_type=jnp.float32)
    qkv = qkv + b_qkv_ref[...]                              # [BS, 3E]
    q = qkv[:, :EMBED_DIM]
    k = qkv[:, EMBED_DIM:2 * EMBED_DIM]
    v = qkv[:, 2 * EMBED_DIM:3 * EMBED_DIM]

    head_mask = const_ref[:, :EMBED_DIM]                    # [H*BS, E] 0/1
    # Block-diagonal packed K / V: row h*BS+j holds k[j] / v[j] restricted to
    # head h's lane range.  Built with a sublane tile + one VPU multiply.
    k_blk = jnp.concatenate([k] * NUM_HEADS, axis=0) * head_mask
    v_blk = jnp.concatenate([v] * NUM_HEADS, axis=0) * head_mask

    # --- all head scores in one MXU pass (contract embed dim, no transpose) ---
    s = lax.dot_general(q, k_blk, (((1,), (1,)), ((), ())),
                        preferred_element_type=jnp.float32)  # [BS, H*BS]
    s = s * scale + mask_ref[...]
    # Global row max is >= every per-head-block max -> valid for stability and
    # cancels in the per-block normalization below.
    s = s - jnp.max(s, axis=-1, keepdims=True)
    p = jnp.exp(s)                                          # unnormalized probs

    # --- PV + both softmax-denominator layouts in one MXU pass ---
    # rhs = [ v_blk (E) | head_mask (E) | ones_blk (H*BS) ]  -> [H*BS, 2E+H*BS]
    rhs = jnp.concatenate([v_blk, const_ref[...]], axis=-1)
    res = jnp.dot(p, rhs, preferred_element_type=jnp.float32)  # [BS, 2E+H*BS]

    # normalized attention output, heads already at their lane offsets [BS, E]
    o = res[:, :EMBED_DIM] / res[:, EMBED_DIM:2 * EMBED_DIM]

    # --- fused attention out-projection + MLP layer 1 (+ ReLU), then layer 2 ---
    h1 = jnp.dot(o, w_h1_ref[...], preferred_element_type=jnp.float32)
    h1 = jnp.maximum(h1 + b_h1_ref[...], 0.0)               # ReLU
    y = jnp.dot(h1, w2_ref[...], preferred_element_type=jnp.float32)
    y_ref[...] = y + b2_ref[...]                            # [BS, A]

    # --- attention weights averaged over heads ---
    p_norm = p / res[:, 2 * EMBED_DIM:]                     # per-head softmax
    w_sum = p_norm[:, :bs]
    for h in range(1, NUM_HEADS):
        w_sum = w_sum + p_norm[:, h * bs:(h + 1) * bs]      # [BS, BS]
    blocks = [w_sum[b * seq:(b + 1) * seq, b * seq:(b + 1) * seq]
              for b in range(batch)]
    attw_ref[...] = jnp.concatenate(blocks, axis=0) * (1.0 / NUM_HEADS)


# --------------------------- one-time preparation -----------------------------
def prepare_params(params, batch, seq):
    """Exact algebraic weight fusion + constant packing matrices.

    Called ONCE (hoisted out of the per-forward path):
      qkv(x) = (x @ w_emb + b_emb) @ w_in + b_in  = x @ w_qkv + b_qkv
      h1_pre = (o @ w_out + b_out) @ w1 + b1      = o @ w_h1  + b_h1
    """
    w_qkv = jnp.dot(params["w_emb"], params["w_in"])
    b_qkv = jnp.dot(params["b_emb"], params["w_in"]) + params["b_in"]
    w_h1 = jnp.dot(params["w_out"], params["w1"])
    b_h1 = jnp.dot(params["b_out"], params["w1"]) + params["b1"]

    bs = batch * seq
    hbs = NUM_HEADS * bs

    # additive cross-batch mask, tiled over head blocks along lanes: [BS, H*BS]
    row_b = jnp.arange(bs, dtype=jnp.int32)[:, None] // seq
    col_b = (jnp.arange(hbs, dtype=jnp.int32)[None, :] % bs) // seq
    mask_add = jnp.where(row_b == col_b, 0.0, -1e30).astype(jnp.float32)

    # constant RHS tail: [head_mask (E) | ones_blockdiag (H*BS)] : [H*BS, E+H*BS]
    row_h = jnp.arange(hbs, dtype=jnp.int32)[:, None] // bs
    col_e = jnp.arange(EMBED_DIM, dtype=jnp.int32)[None, :] // HEAD_DIM
    col_p = jnp.arange(hbs, dtype=jnp.int32)[None, :] // bs
    head_mask = (row_h == col_e).astype(jnp.float32)         # [H*BS, E]
    ones_blk = (row_h == col_p).astype(jnp.float32)          # [H*BS, H*BS]
    const = jnp.concatenate([head_mask, ones_blk], axis=-1)  # [H*BS, E+H*BS]

    return dict(w_qkv=w_qkv, b_qkv=b_qkv, w_h1=w_h1, b_h1=b_h1,
                w2=params["w2"], b2=params["b2"],
                mask_add=mask_add, const=const)


# ------------------------------- wrapper -------------------------------------
@jax.jit
def mlp_forward(x, fused):
    B, S, _ = x.shape
    bs = B * S
    f32 = jnp.float32
    x2d = x.reshape(bs, STATE_DIM)

    def full(shape):
        return pl.BlockSpec(shape, lambda i: (0, 0))

    kernel = functools.partial(mlp_attn_kernel, batch=B, seq=S)

    y2d, attw2d = pl.pallas_call(
        kernel,
        grid=(1,),
        in_specs=[
            full((bs, STATE_DIM)),
            full(fused["w_qkv"].shape), full(fused["b_qkv"].shape),
            full(fused["w_h1"].shape), full(fused["b_h1"].shape),
            full(fused["w2"].shape), full(fused["b2"].shape),
            full(fused["mask_add"].shape), full(fused["const"].shape),
        ],
        out_specs=(full((bs, ACTION_DIM)), full((bs, S))),
        out_shape=(jax.ShapeDtypeStruct((bs, ACTION_DIM), f32),
                   jax.ShapeDtypeStruct((bs, S), f32)),
        compiler_params=pltpu.CompilerParams(
            dimension_semantics=("arbitrary",)),
    )(x2d, fused["w_qkv"], fused["b_qkv"], fused["w_h1"], fused["b_h1"],
      fused["w2"], fused["b2"], fused["mask_add"], fused["const"])

    return y2d.reshape(B, S, ACTION_DIM), attw2d.reshape(B, S, S)


# --------------------------- deterministic params ----------------------------
def init_params(key):
    def linear(key, fan_in, fan_out):
        kw, kb = jax.random.split(key)
        bound = 1.0 / math.sqrt(fan_in)
        w = jax.random.uniform(kw, (fan_in, fan_out), jnp.float32, -bound, bound)
        b = jax.random.uniform(kb, (1, fan_out), jnp.float32, -bound, bound)
        return w, b

    keys = jax.random.split(key, 6)
    w_emb, b_emb = linear(keys[0], STATE_DIM, EMBED_DIM)
    w_in, b_in = linear(keys[1], EMBED_DIM, 3 * EMBED_DIM)
    w_out, b_out = linear(keys[2], EMBED_DIM, EMBED_DIM)
    w1, b1 = linear(keys[3], EMBED_DIM, HIDDEN_DIMS[0])
    w2, b2 = linear(keys[4], HIDDEN_DIMS[0], ACTION_DIM)
    return dict(w_emb=w_emb, b_emb=b_emb, w_in=w_in, b_in=b_in,
                w_out=w_out, b_out=b_out, w1=w1, b1=b1, w2=w2, b2=b2)


if __name__ == "__main__":
    key = jax.random.PRNGKey(0)
    k_x, k_p = jax.random.split(key)
    x = jax.random.normal(k_x, (BATCH, SEQ, STATE_DIM), jnp.float32)
    params = init_params(k_p)

    # one-time fusion / constant precomputation (off the per-call path)
    fused = prepare_params(params, BATCH, SEQ)
    fused = jax.tree_util.tree_map(jax.block_until_ready, fused)

    y, attw = mlp_forward(x, fused)
    jax.block_until_ready((y, attw))

    assert y.shape == (BATCH, SEQ, ACTION_DIM)
    assert attw.shape == (BATCH, SEQ, SEQ)
    assert bool(jnp.all(jnp.isfinite(y))) and bool(jnp.all(jnp.isfinite(attw)))
    # attention weights (head-averaged softmax) must sum to ~1 per row
    assert bool(jnp.allclose(jnp.sum(attw, axis=-1), 1.0, atol=1e-3))
    print("KERNEL_OK")
</pallas_src>

<mosaic_0001>
module attributes {stable_mosaic.version = 11 : i64} {
  func.func @mlp_attn_kernel(%arg0: i32, %arg1: memref<16x16xf32, #tpu.memory_space<vmem>>, %arg2: memref<16x96xf32, #tpu.memory_space<vmem>>, %arg3: memref<1x96xf32, #tpu.memory_space<vmem>>, %arg4: memref<32x32xf32, #tpu.memory_space<vmem>>, %arg5: memref<1x32xf32, #tpu.memory_space<vmem>>, %arg6: memref<32x8xf32, #tpu.memory_space<vmem>>, %arg7: memref<1x8xf32, #tpu.memory_space<vmem>>, %arg8: memref<16x64xf32, #tpu.memory_space<vmem>>, %arg9: memref<64x96xf32, #tpu.memory_space<vmem>>, %arg10: memref<16x8xf32, #tpu.memory_space<vmem>>, %arg11: memref<16x8xf32, #tpu.memory_space<vmem>>) attributes {dimension_semantics = [#tpu.dimension_semantics<arbitrary>], iteration_bounds = array<i64: 1>, scalar_prefetch = 0 : i64, scratch_operands = 0 : i64, tpu.core_type = #tpu.core_type<tc>, window_params = [{pipeline_mode = #tpu.pipeline_mode<synchronous>, transform_indices = @transform_0, window_bounds = array<i64: 16, 16>}, {pipeline_mode = #tpu.pipeline_mode<synchronous>, transform_indices = @transform_1, window_bounds = array<i64: 16, 96>}, {pipeline_mode = #tpu.pipeline_mode<synchronous>, transform_indices = @transform_2, window_bounds = array<i64: 1, 96>}, {pipeline_mode = #tpu.pipeline_mode<synchronous>, transform_indices = @transform_3, window_bounds = array<i64: 32, 32>}, {pipeline_mode = #tpu.pipeline_mode<synchronous>, transform_indices = @transform_4, window_bounds = array<i64: 1, 32>}, {pipeline_mode = #tpu.pipeline_mode<synchronous>, transform_indices = @transform_5, window_bounds = array<i64: 32, 8>}, {pipeline_mode = #tpu.pipeline_mode<synchronous>, transform_indices = @transform_6, window_bounds = array<i64: 1, 8>}, {pipeline_mode = #tpu.pipeline_mode<synchronous>, transform_indices = @transform_7, window_bounds = array<i64: 16, 64>}, {pipeline_mode = #tpu.pipeline_mode<synchronous>, transform_indices = @transform_8, window_bounds = array<i64: 64, 96>}, {pipeline_mode = #tpu.pipeline_mode<synchronous>, transform_indices = @transform_9, window_bounds = array<i64: 16, 8>}, {pipeline_mode = #tpu.pipeline_mode<synchronous>, transform_indices = @transform_10, window_bounds = array<i64: 16, 8>}]} {
    %c0 = arith.constant 0 : index
    %c0_0 = arith.constant 0 : index
    %0 = vector.load %arg1[%c0, %c0_0] : memref<16x16xf32, #tpu.memory_space<vmem>>, vector<16x16xf32>
    %c0_1 = arith.constant 0 : index
    %c0_2 = arith.constant 0 : index
    %1 = vector.load %arg2[%c0_1, %c0_2] : memref<16x96xf32, #tpu.memory_space<vmem>>, vector<16x96xf32>
    %cst = arith.constant dense<0.000000e+00> : vector<16x96xf32>
    %2 = tpu.matmul %0, %1, %cst {dimension_numbers = #tpu.dot_dimension_numbers<[1], [0], [0], [1], [0, 0, 1, 1], [], []>} : vector<16x16xf32>, vector<16x96xf32>, vector<16x96xf32> -> vector<16x96xf32>
    %c0_3 = arith.constant 0 : index
    %c0_4 = arith.constant 0 : index
    %3 = vector.load %arg3[%c0_3, %c0_4] : memref<1x96xf32, #tpu.memory_space<vmem>>, vector<1x96xf32>
    %4 = vector.broadcast %3 : vector<1x96xf32> to vector<16x96xf32>
    %5 = arith.addf %2, %4 : vector<16x96xf32>
    %6 = vector.extract_strided_slice %5 {offsets = [0, 0], sizes = [16, 32], strides = [1, 1]} : vector<16x96xf32> to vector<16x32xf32>
    %7 = vector.extract_strided_slice %5 {offsets = [0, 32], sizes = [16, 32], strides = [1, 1]} : vector<16x96xf32> to vector<16x32xf32>
    %8 = vector.extract_strided_slice %5 {offsets = [0, 64], sizes = [16, 32], strides = [1, 1]} : vector<16x96xf32> to vector<16x32xf32>
    %c0_5 = arith.constant 0 : index
    %c0_6 = arith.constant 0 : index
    %9 = vector.load %arg9[%c0_5, %c0_6] : memref<64x96xf32, #tpu.memory_space<vmem>>, vector<64x32xf32>
    %10 = tpu.concatenate %7, %7, %7, %7 in 0 : vector<16x32xf32>, vector<16x32xf32>, vector<16x32xf32>, vector<16x32xf32> -> vector<64x32xf32>
    %11 = arith.mulf %10, %9 : vector<64x32xf32>
    %12 = tpu.concatenate %8, %8, %8, %8 in 0 : vector<16x32xf32>, vector<16x32xf32>, vector<16x32xf32>, vector<16x32xf32> -> vector<64x32xf32>
    %13 = arith.mulf %12, %9 : vector<64x32xf32>
    %cst_7 = arith.constant dense<0.000000e+00> : vector<16x64xf32>
    %14 = tpu.matmul %6, %11, %cst_7 {dimension_numbers = #tpu.dot_dimension_numbers<[1], [1], [0], [0], [0, 0, 1, 0], [], []>} : vector<16x32xf32>, vector<64x32xf32>, vector<16x64xf32> -> vector<16x64xf32>
    %cst_8 = arith.constant 0.353553385 : f32
    %15 = vector.broadcast %cst_8 : f32 to vector<16x64xf32>
    %16 = arith.mulf %14, %15 : vector<16x64xf32>
    %c0_9 = arith.constant 0 : index
    %c0_10 = arith.constant 0 : index
    %17 = vector.load %arg8[%c0_9, %c0_10] : memref<16x64xf32, #tpu.memory_space<vmem>>, vector<16x64xf32>
    %18 = arith.addf %16, %17 : vector<16x64xf32>
    %cst_11 = arith.constant dense<0xFF800000> : vector<16xf32>
    %19 = vector.multi_reduction <maximumf>, %18, %cst_11 [1] : vector<16x64xf32> to vector<16xf32>
    %20 = vector.shape_cast %19 : vector<16xf32> to vector<16x1xf32>
    %21 = vector.broadcast %20 : vector<16x1xf32> to vector<16x64xf32>
    %22 = arith.subf %18, %21 : vector<16x64xf32>
    %23 = math.exp %22 : vector<16x64xf32>
    %c0_12 = arith.constant 0 : index
    %c0_13 = arith.constant 0 : index
    %24 = vector.load %arg9[%c0_12, %c0_13] : memref<64x96xf32, #tpu.memory_space<vmem>>, vector<64x96xf32>
    %25 = tpu.concatenate %13, %24 in 1 : vector<64x32xf32>, vector<64x96xf32> -> vector<64x128xf32>
    %cst_14 = arith.constant dense<0.000000e+00> : vector<16x128xf32>
    %26 = tpu.matmul %23, %25, %cst_14 {dimension_numbers = #tpu.dot_dimension_numbers<[1], [0], [0], [1], [0, 0, 1, 1], [], []>} : vector<16x64xf32>, vector<64x128xf32>, vector<16x128xf32> -> vector<16x128xf32>
    %27 = vector.extract_strided_slice %26 {offsets = [0, 0], sizes = [16, 32], strides = [1, 1]} : vector<16x128xf32> to vector<16x32xf32>
    %28 = vector.extract_strided_slice %26 {offsets = [0, 32], sizes = [16, 32], strides = [1, 1]} : vector<16x128xf32> to vector<16x32xf32>
    %29 = arith.divf %27, %28 : vector<16x32xf32>
    %c0_15 = arith.constant 0 : index
    %c0_16 = arith.constant 0 : index
    %30 = vector.load %arg4[%c0_15, %c0_16] : memref<32x32xf32, #tpu.memory_space<vmem>>, vector<32x32xf32>
    %cst_17 = arith.constant dense<0.000000e+00> : vector<16x32xf32>
    %31 = tpu.matmul %29, %30, %cst_17 {dimension_numbers = #tpu.dot_dimension_numbers<[1], [0], [0], [1], [0, 0, 1, 1], [], []>} : vector<16x32xf32>, vector<32x32xf32>, vector<16x32xf32> -> vector<16x32xf32>
    %c0_18 = arith.constant 0 : index
    %c0_19 = arith.constant 0 : index
    %32 = vector.load %arg5[%c0_18, %c0_19] : memref<1x32xf32, #tpu.memory_space<vmem>>, vector<1x32xf32>
    %33 = vector.broadcast %32 : vector<1x32xf32> to vector<16x32xf32>
    %34 = arith.addf %31, %33 : vector<16x32xf32>
    %cst_20 = arith.constant 0.000000e+00 : f32
    %35 = vector.broadcast %cst_20 : f32 to vector<16x32xf32>
    %36 = arith.maximumf %34, %35 : vector<16x32xf32>
    %c0_21 = arith.constant 0 : index
    %c0_22 = arith.constant 0 : index
    %37 = vector.load %arg6[%c0_21, %c0_22] : memref<32x8xf32, #tpu.memory_space<vmem>>, vector<32x8xf32>
    %cst_23 = arith.constant dense<0.000000e+00> : vector<16x8xf32>
    %38 = tpu.matmul %36, %37, %cst_23 {dimension_numbers = #tpu.dot_dimension_numbers<[1], [0], [0], [1], [0, 0, 1, 1], [], []>} : vector<16x32xf32>, vector<32x8xf32>, vector<16x8xf32> -> vector<16x8xf32>
    %c0_24 = arith.constant 0 : index
    %c0_25 = arith.constant 0 : index
    %39 = vector.load %arg7[%c0_24, %c0_25] : memref<1x8xf32, #tpu.memory_space<vmem>>, vector<1x8xf32>
    %40 = vector.broadcast %39 : vector<1x8xf32> to vector<16x8xf32>
    %41 = arith.addf %38, %40 : vector<16x8xf32>
    %c0_26 = arith.constant 0 : index
    %c0_27 = arith.constant 0 : index
    %42 = vector.load %arg10[%c0_26, %c0_27] : memref<16x8xf32, #tpu.memory_space<vmem>>, vector<16x8xf32>
    tpu.vector_store %arg10[%c0_26, %c0_27], %41 {strides = array<i32>} : memref<16x8xf32, #tpu.memory_space<vmem>>, vector<16x8xf32>,
    %43 = vector.extract_strided_slice %26 {offsets = [0, 64], sizes = [16, 64], strides = [1, 1]} : vector<16x128xf32> to vector<16x64xf32>
    %44 = arith.divf %23, %43 : vector<16x64xf32>
    %45 = vector.extract_strided_slice %44 {offsets = [0, 0], sizes = [16, 16], strides = [1, 1]} : vector<16x64xf32> to vector<16x16xf32>
    %46 = vector.extract_strided_slice %44 {offsets = [0, 16], sizes = [16, 16], strides = [1, 1]} : vector<16x64xf32> to vector<16x16xf32>
    %47 = arith.addf %45, %46 : vector<16x16xf32>
    %48 = vector.extract_strided_slice %44 {offsets = [0, 32], sizes = [16, 16], strides = [1, 1]} : vector<16x64xf32> to vector<16x16xf32>
    %49 = arith.addf %47, %48 : vector<16x16xf32>
    %50 = vector.extract_strided_slice %44 {offsets = [0, 48], sizes = [16, 16], strides = [1, 1]} : vector<16x64xf32> to vector<16x16xf32>
    %51 = arith.addf %49, %50 : vector<16x16xf32>
    %52 = vector.extract_strided_slice %51 {offsets = [0, 0], sizes = [8, 8], strides = [1, 1]} : vector<16x16xf32> to vector<8x8xf32>
    %53 = vector.extract_strided_slice %51 {offsets = [8, 8], sizes = [8, 8], strides = [1, 1]} : vector<16x16xf32> to vector<8x8xf32>
    %54 = tpu.concatenate %52, %53 in 0 : vector<8x8xf32>, vector<8x8xf32> -> vector<16x8xf32>
    %cst_28 = arith.constant 2.500000e-01 : f32
    %55 = vector.broadcast %cst_28 : f32 to vector<16x8xf32>
    %56 = arith.mulf %54, %55 : vector<16x8xf32>
    %c0_29 = arith.constant 0 : index
    %c0_30 = arith.constant 0 : index
    %57 = vector.load %arg11[%c0_29, %c0_30] : memref<16x8xf32, #tpu.memory_space<vmem>>, vector<16x8xf32>
    tpu.vector_store %arg11[%c0_29, %c0_30], %56 {strides = array<i32>} : memref<16x8xf32, #tpu.memory_space<vmem>>, vector<16x8xf32>,
    return
  }
  func.func @transform_0(%arg0: i32) -> (i32, i32) {
    %c0_i32 = arith.constant 0 : i32
    %c0_i32_0 = arith.constant 0 : i32
    %c0_i32_1 = arith.constant 0 : i32
    return %c0_i32, %c0_i32_0 : i32, i32
  }
  func.func @transform_1(%arg0: i32) -> (i32, i32) {
    %c0_i32 = arith.constant 0 : i32
    %c0_i32_0 = arith.constant 0 : i32
    %c0_i32_1 = arith.constant 0 : i32
    return %c0_i32, %c0_i32_0 : i32, i32
  }
  func.func @transform_2(%arg0: i32) -> (i32, i32) {
    %c0_i32 = arith.constant 0 : i32
    %c0_i32_0 = arith.constant 0 : i32
    %c0_i32_1 = arith.constant 0 : i32
    return %c0_i32, %c0_i32_0 : i32, i32
  }
  func.func @transform_3(%arg0: i32) -> (i32, i32) {
    %c0_i32 = arith.constant 0 : i32
    %c0_i32_0 = arith.constant 0 : i32
    %c0_i32_1 = arith.constant 0 : i32
    return %c0_i32, %c0_i32_0 : i32, i32
  }
  func.func @transform_4(%arg0: i32) -> (i32, i32) {
    %c0_i32 = arith.constant 0 : i32
    %c0_i32_0 = arith.constant 0 : i32
    %c0_i32_1 = arith.constant 0 : i32
    return %c0_i32, %c0_i32_0 : i32, i32
  }
  func.func @transform_5(%arg0: i32) -> (i32, i32) {
    %c0_i32 = arith.constant 0 : i32
    %c0_i32_0 = arith.constant 0 : i32
    %c0_i32_1 = arith.constant 0 : i32
    return %c0_i32, %c0_i32_0 : i32, i32
  }
  func.func @transform_6(%arg0: i32) -> (i32, i32) {
    %c0_i32 = arith.constant 0 : i32
    %c0_i32_0 = arith.constant 0 : i32
    %c0_i32_1 = arith.constant 0 : i32
    return %c0_i32, %c0_i32_0 : i32, i32
  }
  func.func @transform_7(%arg0: i32) -> (i32, i32) {
    %c0_i32 = arith.constant 0 : i32
    %c0_i32_0 = arith.constant 0 : i32
    %c0_i32_1 = arith.constant 0 : i32
    return %c0_i32, %c0_i32_0 : i32, i32
  }
  func.func @transform_8(%arg0: i32) -> (i32, i32) {
    %c0_i32 = arith.constant 0 : i32
    %c0_i32_0 = arith.constant 0 : i32
    %c0_i32_1 = arith.constant 0 : i32
    return %c0_i32, %c0_i32_0 : i32, i32
  }
  func.func @transform_9(%arg0: i32) -> (i32, i32) {
    %c0_i32 = arith.constant 0 : i32
    %c0_i32_0 = arith.constant 0 : i32
    %c0_i32_1 = arith.constant 0 : i32
    return %c0_i32, %c0_i32_0 : i32, i32
  }
  func.func @transform_10(%arg0: i32) -> (i32, i32) {
    %c0_i32 = arith.constant 0 : i32
    %c0_i32_0 = arith.constant 0 : i32
    %c0_i32_1 = arith.constant 0 : i32
    return %c0_i32, %c0_i32_0 : i32, i32
  }
}

</mosaic_0001>

<bundles_post_ra>
// kernel: mlp_forward.1
= control target key start
LH: loop header
LB: loop body
LE: loop exit
PB: predicated region body
PF: predicated region fallthrough
CT: control target
= control target key end

     0   :  { %16 = vsyncpa [#allocation3], 0  ;;  %s1309_s0 = inlined_call_operand.vmem [shape: f32[16,16], index: 0, kind: input, shape index: {}]   ;;  %s1310_s1 = inlined_call_operand.hbm [shape: f32[16,96], index: 1, kind: input, shape index: {}]   ;;  %s1311_s2 = inlined_call_operand.vmem [shape: f32[1,96], index: 2, kind: input, shape index: {}]   ;;  %s1312_s3 = inlined_call_operand.vmem [shape: f32[32,32], index: 3, kind: input, shape index: {}]   ;;  %s1313_s4 = inlined_call_operand.vmem [shape: f32[1,32], index: 4, kind: input, shape index: {}]   ;;  %s1314_s5 = inlined_call_operand.vmem [shape: f32[32,8], index: 5, kind: input, shape index: {}]   ;;  %s1315_s6 = inlined_call_operand.vmem [shape: f32[1,8], index: 6, kind: input, shape index: {}]   ;;  %s1316_s7 = inlined_call_operand.hbm [shape: f32[16,64], index: 7, kind: input, shape index: {}]   ;;  %s1317_s8 = inlined_call_operand.hbm [shape: f32[64,96], index: 8, kind: input, shape index: {}]   ;;  %s1318_s9 = inlined_call_operand.hbm [shape: f32[16,8], index: 9, kind: output, shape index: {0}]   ;;  %s1319_s10 = inlined_call_operand.hbm [shape: f32[16,8], index: 10, kind: output, shape index: {1}]  }
   0x1   :  { %17 = vsyncpa [#allocation6], 0 }
   0x2   :  { %18 = vsyncpa [#allocation4], 0 }
   0x3   :  { %19 = vsyncpa [#allocation10], 0  ;;  %s1048_s13 = smov [#allocation5]   ;;  %s1049_s15 = smov [#allocation2]  }
   0x4   :  { %s49_s14 = sshll.u32 %s1048_s13, 4  ;;  %s27_s16 = sshll.u32 %s1049_s15, 4  ;;  %s50_s14 = int_to_ptr.vmem [resolvable:$true] %s49_s14  ;;  %s28_s16 = int_to_ptr.vmem [resolvable:$true] %s27_s16 }
   0x5   :  { %s948_s17 = scalar_lea.vmem %s50_s14, 256  ;;  %p953_p1 = scmp.lt.s32.totalorder %s50_s14, %s50_s14 }
   0x6   :  { %p949_p0 = scmp.ne.s32.totalorder %s50_s14, %s948_s17  ;;  %p954_p2 = scmp.lt.s32.totalorder %s948_s17, %s948_s17 }
   0x8   :  { %p955_p3 = por %p954_p2, %p953_p1 }
   0xa   :  { %p956_p4 = pnand %p955_p3, %p949_p0 }
   0xc   :  { %959 = shalt.err (!%p956_p4)
}
   0xd   :  { %s1050_s18 = smov 128   ;;  %s1051_s19 = smov 8  }
   0xe   :  { %55 = dma.hbm_to_vmem [thread:$0]  %s1316_s7, 256, %s50_s14, [#allocation6], %s1050_s18, %s1050_s18, %s1051_s19  }
   0xf   :  { %s968_s22 = scalar_lea.vmem %s28_s16, 256  ;;  %p973_p6 = scmp.lt.s32.totalorder %s28_s16, %s28_s16 }
  0x10   :  { %p969_p5 = scmp.ne.s32.totalorder %s28_s16, %s968_s22  ;;  %p974_p7 = scmp.lt.s32.totalorder %s968_s22, %s968_s22 }
  0x12   :  { %p975_p8 = por %p974_p7, %p973_p6 }
  0x14   :  { %p976_p9 = pnand %p975_p8, %p969_p5 }
  0x16   :  { %979 = shalt.err (!%p976_p9)
}
  0x17   :  { %33 = dma.hbm_to_vmem [thread:$0]  %s1310_s1, 256, %s28_s16, [#allocation3], %s1050_s18, %s1050_s18, %s1051_s19  }
  0x18   :  { %s1052_s25 = smov [#allocation7]  }
  0x19   :  { %s61_s26 = sshll.u32 %s1052_s25, 4  ;;  %s62_s26 = int_to_ptr.vmem [resolvable:$true] %s61_s26 }
  0x1a   :  { %s988_s27 = scalar_lea.vmem %s62_s26, 1024  ;;  %p993_p11 = scmp.lt.s32.totalorder %s62_s26, %s62_s26 }
  0x1b   :  { %p989_p10 = scmp.ne.s32.totalorder %s62_s26, %s988_s27  ;;  %p994_p12 = scmp.lt.s32.totalorder %s988_s27, %s988_s27 }
  0x1d   :  { %p995_p13 = por %p994_p12, %p993_p11 }
  0x1f   :  { %p996_p0 = pnand %p995_p13, %p989_p10 }
  0x21   :  { %999 = shalt.err (!%p996_p0)
}
  0x22   :  { %67 = dma.hbm_to_vmem [thread:$0]  %s1317_s8, 1024, %s62_s26, [#allocation6], %s1050_s18, %s1050_s18, %s1051_s19  }
  0x23   :  { %1040 = dma.done.wait [#allocation3], 256  }
  0x24   :  { %1041 = vsyncadd [#allocation3], 4294967040 }
  0x25   :  { %1042 = dma.done.wait [#allocation6], 1280  }
  0x26   :  { %1043 = vsyncadd [#allocation6], 4294966016  ;;  %vm88_vm0 = vcmask 130048   ;;  %v80_v0 = vld [vmem:[#allocation2 + $0x8] sm:$0xff]  ;;  %v79_v1 = vld [vmem:[#allocation2] sm:$0xff]  ;;  %s1053_s8 = smov 32  }
  0x27   :  { %v77_v2 = vld [vmem:[%s1309_s0] sm:$0xff]  ;;  %848 = vmatprep.subr.mxu0 %v80_v0  ;;  %v177_v3 = vld [vmem:[#allocation7 + $0x38] sm:$0xff]  ;;  %v175_v4 = vld [vmem:[#allocation7 + $0x28] sm:$0xff]  ;;  %vm274_vm1 = vcmask 261120   ;;  %s1054_s13 = smov 96   ;;  %vm378_vm2 = vcmask 523264  }
  0x28   :  { %852 = vmatprep.mubr.msk.f32.mxu0 %vm88_vm0, %v77_v2  ;;  %849 = vmatpush3.msra.mxu0 %v80_v0  ;;  %v78_v5 = vld [vmem:[%s1309_s0 + $0x8] sm:$0xff]  ;;  %v176_v6 = vld [vmem:[#allocation7 + $0x30] sm:$0xff]  ;;  %v174_v7 = vld [vmem:[#allocation7 + $0x20] sm:$0xff]  ;;  %s1057_s24 = smov 80   ;;  %s1058_s11 = smov 120   ;;  %vm710_vm3 = vcmask 64512  }
  0x29   :  { %200 = vrot.lane.b32.xlu0 %v177_v3, %s1053_s8  ;;  %850 = vmatprep.subr.mxu0 %v79_v1  ;;  %v173_v8 = vld [vmem:[#allocation7 + $0x18] sm:$0xff]  ;;  %v172_v9 = vld [vmem:[#allocation7 + $0x10] sm:$0xff]  ;;  %v171_v10 = vld [vmem:[#allocation7 + $0x8] sm:$0xff]  ;;  %s1059_s0 = smov [#allocation9]  }
  0x2a   :  { %196 = vrot.lane.b32.xlu1 %v175_v4, %s1053_s8  ;;  %851 = vmatpush3.msra.mxu0 %v79_v1  ;;  %v170_v11 = vld [vmem:[#allocation7] sm:$0xff]  ;;  %s774_s12 = sshll.u32 %s1059_s0, 4  ;;  %s775_s12 = int_to_ptr.vmem [resolvable:$true] %s774_s12 }
  0x2b   :  { %853 = vmatmul.mubr.msk.f32.vlgmr.msra.gmra.mxu0 %vm88_vm0, %v78_v5  ;;  %v791_v14 = vld [vmem:[%s1311_s2] ss:$0 sm:$0xff]  ;;  %s1055_s2 = smov 64   ;;  %p1005_p2 = scmp.lt.s32.totalorder %s775_s12, %s775_s12 }
  0x2d   :  { %198 = vrot.lane.b32.xlu0 %v176_v6, %s1053_s8 }
  0x2e   :  { %194 = vrot.lane.b32.xlu1 %v174_v7, %s1053_s8 }
  0x31   :  { %192 = vrot.lane.b32.xlu0 %v173_v8, %s1053_s8 }
  0x32   :  { %190 = vrot.lane.b32.xlu1 %v172_v9, %s1053_s8 }
  0x35   :  { %188 = vrot.lane.b32.xlu0 %v171_v10, %s1053_s8 }
  0x36   :  { %186 = vrot.lane.b32.xlu1 %v170_v11, %s1053_s8 }
  0x9b   :  { %v1142_v12 = vpop.permute.xlu0 %200 }
  0x9c   :  { %v1144_v13 = vpop.permute.xlu1 %196 }
  0x9f   :  { %v1149_v15 = vpop.permute.xlu0 %198 }
  0xa0   :  { %v1153_v18 = vpop.permute.xlu1 %194 }
  0xa3   :  { %v1164_v23 = vpop.permute.xlu0 %192 }
  0xa4   :  { %v1169_v25 = vpop.permute.xlu1 %190 }
  0xa7   :  { %v1177_v28 = vpop.permute.xlu0 %188 }
  0xa8   :  { %v1182_v30 = vpop.permute.xlu1 %186 }
  0xeb   :  { %v854_v16 = vpop.f32.mrf.mxu0 }
  0xec   :  { %v1151_v17 = vadd.f32 %v854_v16, %v791_v14 }
  0xed   :  { %v161_v19 = vpop.f32.mrf.mxu0 }
  0xee   :  { %v1155_v20 = vadd.f32 %v791_v14, %v161_v19  ;;  %v217_v21 = vmul.f32 %v1142_v12, %v1151_v17  ;;  %v215_v24 = vmul.f32 %v1144_v13, %v1151_v17  ;;  %v213_v27 = vmul.f32 %v1164_v23, %v1151_v17 }
  0xef   :  { %v211_v31 = vmul.f32 %v1177_v28, %v1151_v17 }
  0xf0   :  { %272 = vrot.lane.b32.xlu0 %v217_v21, %s1054_s13  ;;  %871 = vmatprep.mubr.msk.f32.mxu1 %vm274_vm1, %v1155_v20  ;;  %v216_v22 = vmul.f32 %v1149_v15, %v1155_v20  ;;  %v214_v26 = vmul.f32 %v1153_v18, %v1155_v20  ;;  %v212_v29 = vmul.f32 %v1169_v25, %v1155_v20 }
  0xf1   :  { %v210_v32 = vmul.f32 %v1182_v30, %v1155_v20 }
  0xf2   :  { %270 = vrot.lane.b32.xlu1 %v216_v22, %s1054_s13 }
  0xf4   :  { %268 = vrot.lane.b32.xlu0 %v215_v24, %s1054_s13 }
  0xf6   :  { %266 = vrot.lane.b32.xlu1 %v214_v26, %s1054_s13 }
  0xf8   :  { %264 = vrot.lane.b32.xlu0 %v213_v27, %s1054_s13  ;;  %v527_v27 = vld [vmem:[%s1312_s3 + $0x18] sm:$0xff] }
  0xfa   :  { %262 = vrot.lane.b32.xlu1 %v212_v29, %s1054_s13  ;;  %v525_v29 = vld [vmem:[%s1312_s3 + $0x8] sm:$0xff] }
  0xfc   :  { %260 = vrot.lane.b32.xlu0 %v211_v31, %s1054_s13 }
  0xfe   :  { %258 = vrot.lane.b32.xlu1 %v210_v32, %s1054_s13 }
 0x100   :  { %232 = vrot.lane.b32.xlu0 %v177_v3, %s1055_s2 }
 0x102   :  { %230 = vrot.lane.b32.xlu1 %v176_v6, %s1055_s2 }
 0x104   :  { %228 = vrot.lane.b32.xlu0 %v175_v4, %s1055_s2  ;;  %v375_v4 = vld [vmem:[#allocation5 + $0x8] sm:$0xff] }
 0x106   :  { %226 = vrot.lane.b32.xlu1 %v174_v7, %s1055_s2  ;;  %v374_v7 = vld [vmem:[#allocation5] sm:$0xff] }
 0x108   :  { %224 = vrot.lane.b32.xlu0 %v173_v8, %s1055_s2 }
 0x10a   :  { %222 = vrot.lane.b32.xlu1 %v172_v9, %s1055_s2 }
 0x10c   :  { %220 = vrot.lane.b32.xlu0 %v171_v10, %s1055_s2 }
 0x10e   :  { %218 = vrot.lane.b32.xlu1 %v170_v11, %s1055_s2 }
 0x162   :  { %v273_v33 = vpop.permute.xlu0 %272 }
 0x163   :  { %855 = vmatprep.subr.msk.mxu1 %vm274_vm1, %v273_v33 }
 0x164   :  { %856 = vmatpush3.xpose.msk.msra.mxu1 %vm274_vm1, %v273_v33  ;;  %v271_v34 = vpop.permute.xlu1 %270 }
 0x165   :  { %857 = vmatprep.subr.msk.mxu1 %vm274_vm1, %v271_v34 }
 0x166   :  { %v269_v35 = vpop.permute.xlu0 %268 }
 0x168   :  { %858 = vmatpush3.xpose.msk.msra.mxu1 %vm274_vm1, %v271_v34  ;;  %v267_v36 = vpop.permute.xlu1 %266 }
 0x169   :  { %859 = vmatprep.subr.msk.mxu1 %vm274_vm1, %v269_v35 }
 0x16a   :  { %v265_v37 = vpop.permute.xlu0 %264 }
 0x16c   :  { %860 = vmatpush3.xpose.msk.msra.mxu1 %vm274_vm1, %v269_v35  ;;  %v263_v38 = vpop.permute.xlu1 %262 }
 0x16d   :  { %861 = vmatprep.subr.msk.mxu1 %vm274_vm1, %v267_v36 }
 0x16e   :  { %v261_v39 = vpop.permute.xlu0 %260 }
 0x170   :  { %862 = vmatpush3.xpose.msk.msra.mxu1 %vm274_vm1, %v267_v36  ;;  %v259_v40 = vpop.permute.xlu1 %258 }
 0x171   :  { %863 = vmatprep.subr.msk.mxu1 %vm274_vm1, %v265_v37 }
 0x172   :  { %v233_v41 = vpop.permute.xlu0 %232 }
 0x173   :  { %v249_v42 = vmul.f32 %v233_v41, %v1151_v17 }
 0x174   :  { %864 = vmatpush3.xpose.msk.msra.mxu1 %vm274_vm1, %v265_v37  ;;  %v231_v43 = vpop.permute.xlu1 %230 }
 0x175   :  { %v248_v44 = vmul.f32 %v231_v43, %v1155_v20  ;;  %413 = vrot.lane.b32.xlu0 %v249_v42, %s1055_s2  ;;  %865 = vmatprep.subr.msk.mxu1 %vm274_vm1, %v263_v38 }
 0x176   :  { %v229_v45 = vpop.permute.xlu0 %228 }
 0x177   :  { %v247_v46 = vmul.f32 %v229_v45, %v1151_v17  ;;  %411 = vrot.lane.b32.xlu1 %v248_v44, %s1055_s2  ;;  %v621_v45 = vld [vmem:[%s1314_s5 + $0x18] sm:$0xff] }
 0x178   :  { %866 = vmatpush3.xpose.msk.msra.mxu1 %vm274_vm1, %v263_v38  ;;  %v227_v47 = vpop.permute.xlu1 %226 }
 0x179   :  { %v246_v48 = vmul.f32 %v227_v47, %v1155_v20  ;;  %409 = vrot.lane.b32.xlu0 %v247_v46, %s1055_s2  ;;  %867 = vmatprep.subr.msk.mxu1 %vm274_vm1, %v261_v39  ;;  %v620_v46 = vld [vmem:[%s1314_s5 + $0x10] sm:$0xff]  ;;  %v619_v47 = vld [vmem:[%s1314_s5 + $0x8] sm:$0xff] }
 0x17a   :  { %v225_v49 = vpop.permute.xlu0 %224 }
 0x17b   :  { %v245_v50 = vmul.f32 %v225_v49, %v1151_v17  ;;  %407 = vrot.lane.b32.xlu1 %v246_v48, %s1055_s2  ;;  %v618_v48 = vld [vmem:[%s1314_s5] sm:$0xff] }
 0x17c   :  { %868 = vmatpush3.xpose.msk.msra.mxu1 %vm274_vm1, %v261_v39  ;;  %v223_v51 = vpop.permute.xlu1 %222 }
 0x17d   :  { %v244_v52 = vmul.f32 %v223_v51, %v1155_v20  ;;  %405 = vrot.lane.b32.xlu0 %v245_v50, %s1055_s2  ;;  %869 = vmatprep.subr.msk.mxu1 %vm274_vm1, %v259_v40 }
 0x17e   :  { %v221_v53 = vpop.permute.xlu0 %220 }
 0x17f   :  { %403 = vrot.lane.b32.xlu1 %v244_v52, %s1055_s2  ;;  %v243_v14 = vmul.f32 %v221_v53, %v1151_v17 }
 0x180   :  { %870 = vmatpush3.xpose.msk.msra.mxu1 %vm274_vm1, %v259_v40  ;;  %v219_v54 = vpop.permute.xlu1 %218 }
 0x183   :  { %872 = vmatmul.mubr.msk.f32.vlgmr.msra.gmra.mxu1 %vm274_vm1, %v1151_v17 }
 0x1e7   :  { %v414_v55 = vpop.permute.xlu0 %413 }
 0x1e8   :  { %v430_v56 = vsel %vm274_vm1, %v414_v55, %v1142_v12 }
 0x1e9   :  { %874 = vmatprep.subr.mxu0 %v430_v56  ;;  %v412_v57 = vpop.permute.xlu1 %411 }
 0x1ea   :  { %875 = vmatpush3.msra.mxu0 %v430_v56  ;;  %v429_v58 = vsel %vm274_vm1, %v412_v57, %v1149_v15 }
 0x1eb   :  { %v410_v59 = vpop.permute.xlu0 %409  ;;  %876 = vmatprep.subr.mxu0 %v429_v58 }
 0x1ec   :  { %877 = vmatpush3.msra.mxu0 %v429_v58  ;;  %v428_v60 = vsel %vm274_vm1, %v410_v59, %v1144_v13  ;;  %v242_v13 = vmul.f32 %v219_v54, %v1155_v20 }
 0x1ed   :  { %878 = vmatprep.subr.mxu0 %v428_v60  ;;  %v408_v61 = vpop.permute.xlu1 %407 }
 0x1ee   :  { %879 = vmatpush3.msra.mxu0 %v428_v60  ;;  %v427_v62 = vsel %vm274_vm1, %v408_v61, %v1153_v18 }
 0x1ef   :  { %v406_v63 = vpop.permute.xlu0 %405  ;;  %880 = vmatprep.subr.mxu0 %v427_v62 }
 0x1f0   :  { %881 = vmatpush3.msra.mxu0 %v427_v62  ;;  %v426_v0 = vsel %vm274_vm1, %v406_v63, %v1164_v23  ;;  %v806_v62 = vld [vmem:[%s1313_s4] ss:$0 sm:$0xff] }
 0x1f1   :  { %882 = vmatprep.subr.mxu0 %v426_v0  ;;  %v404_v1 = vpop.permute.xlu1 %403 }
 0x1f2   :  { %883 = vmatpush3.msra.mxu0 %v426_v0  ;;  %v425_v2 = vsel %vm274_vm1, %v404_v1, %v1169_v25 }
 0x1f3   :  { %884 = vmatprep.subr.mxu0 %v425_v2 }
 0x1f4   :  { %885 = vmatpush3.msra.mxu0 %v425_v2 }
 0x243   :  { %v873_v3 = vpop.f32.mrf.mxu1 }
 0x244   :  { %v373_v5 = vmul.f32 0.35355338, %v873_v3 }
 0x245   :  { %v363_v6 = vpop.f32.mrf.mxu1 }
 0x246   :  { %v372_v8 = vmul.f32 0.35355338, %v363_v6  ;;  %v377_v9 = vadd.f32 %v375_v4, %v373_v5 }
 0x248   :  { %v376_v10 = vadd.f32 %v374_v7, %v372_v8  ;;  %v382_v11 = vsel %vm378_vm2, %v377_v9, -inf }
 0x249   :  { %383 = vmax.xlane.f32.xlu1 %v382_v11 }
 0x24a   :  { %v379_v12 = vsel %vm378_vm2, %v376_v10, -inf }
 0x24b   :  { %380 = vmax.xlane.f32.xlu0 %v379_v12 }
 0x25a   :  { %399 = vrot.lane.b32.xlu1 %v242_v13, %s1055_s2 }
 0x261   :  { %401 = vrot.lane.b32.xlu0 %v243_v14, %s1055_s2 }
 0x2d2   :  { %v384_v15 = vpop.xlane.xlu1 %383 }
 0x2d3   :  { %v386_v16 = vsub.f32 %v377_v9, %v384_v15 }
 0x2d4   :  { %v381_v18 = vpop.xlane.xlu0 %380 }
 0x2d5   :  { %v385_v19 = vsub.f32 %v376_v10, %v381_v18  ;;  %v389_v21 = vmul.f32 1.442695, %v386_v16 }
 0x2d6   :  { %v400_v23 = vpop.permute.xlu1 %399 }
 0x2d7   :  { %v387_v22 = vmul.f32 1.442695, %v385_v19  ;;  %v423_v17 = vsel %vm274_vm1, %v400_v23, %v1182_v30  ;;  %v524_v30 = vld [vmem:[%s1312_s3] sm:$0xff] }
 0x2d8   :  { %v402_v24 = vpop.permute.xlu0 %401 }
 0x2d9   :  { %928 = vpow2.f32 %v387_v22  ;;  %v424_v25 = vsel %vm274_vm1, %v402_v24, %v1177_v28  ;;  %v526_v28 = vld [vmem:[%s1312_s3 + $0x10] sm:$0xff]  ;;  %s1056_s3 = smov 112  }
 0x2da   :  { %930 = vpow2.f32 %v389_v21  ;;  %886 = vmatprep.subr.mxu0 %v424_v25 }
 0x2db   :  { %887 = vmatpush3.msra.mxu0 %v424_v25 }
 0x2dc   :  { %888 = vmatprep.subr.mxu0 %v423_v17 }
 0x2dd   :  { %889 = vmatpush3.msra.mxu0 %v423_v17 }
 0x2de   :  { %893 = vmatprep.subr.mxu0 %v527_v27 }
 0x2e6   :  { %v929_v20 = vpop.eup %928 }
 0x2e7   :  { %v931_v26 = vpop.eup %930  ;;  %890 = vmatprep.mubr.msk.f32.mxu0 %vm378_vm2, %v929_v20 }
 0x2e8   :  { %891 = vmatmul.mubr.msk.f32.vlgmr.msra.gmra.mxu0 %vm378_vm2, %v931_v26 }
 0x2e9   :  { %894 = vmatpush3.msra.mxu0 %v527_v27 }
 0x2ea   :  { %895 = vmatprep.subr.mxu0 %v526_v28 }
 0x2eb   :  { %896 = vmatpush3.msra.mxu0 %v526_v28 }
 0x2ec   :  { %897 = vmatprep.subr.mxu0 %v525_v29 }
 0x2ed   :  { %898 = vmatpush3.msra.mxu0 %v525_v29 }
 0x2ee   :  { %899 = vmatprep.subr.mxu0 %v524_v30 }
 0x2ef   :  { %900 = vmatpush3.msra.mxu0 %v524_v30 }
 0x2f0   :  { %904 = vmatprep.subr.mxu0 %v621_v45 }
 0x3a8   :  { %v892_v31 = vpop.f32.mrf.mxu0 }
 0x3a9   :  { %516 = vrot.lane.b32.xlu1 %v892_v31, %s1054_s13 }
 0x3aa   :  { %v503_v32 = vpop.f32.mrf.mxu0 }
 0x3ab   :  { %514 = vrot.lane.b32.xlu0 %v503_v32, %s1054_s13 }
 0x3ad   :  { %713 = vrot.lane.b32.xlu1 %v503_v32, %s1055_s2 }
 0x3af   :  { %715 = vrot.lane.b32.xlu0 %v892_v31, %s1055_s2 }
 0x41b   :  { %v517_v33 = vpop.permute.xlu1 %516 }
 0x41c   :  { %932 = vrcp.f32 %v517_v33 }
 0x41d   :  { %v515_v34 = vpop.permute.xlu0 %514 }
 0x41e   :  { %934 = vrcp.f32 %v515_v34 }
 0x41f   :  { %v714_v35 = vpop.permute.xlu1 %713 }
 0x421   :  { %v716_v36 = vpop.permute.xlu0 %715 }
 0x422   :  { %936 = vrcp.f32 %v716_v36 }
 0x423   :  { %938 = vrcp.f32 %v714_v35 }
 0x429   :  { %v933_v37 = vpop.eup %932 }
 0x42a   :  { %v523_v40 = vmul.f32 %v933_v37, %v892_v31 }
 0x42b   :  { %v935_v38 = vpop.eup %934 }
 0x42c   :  { %v521_v39 = vmul.f32 %v935_v38, %v503_v32 }
 0x42e   :  { %901 = vmatprep.mubr.msk.f32.mxu0 %vm274_vm1, %v521_v39 }
 0x42f   :  { %v937_v41 = vpop.eup %936  ;;  %902 = vmatmul.mubr.msk.f32.vlgmr.msra.gmra.mxu0 %vm274_vm1, %v523_v40 }
 0x430   :  { %v722_v42 = vmul.f32 %v937_v41, %v931_v26  ;;  %v939_v43 = vpop.eup %938  ;;  %905 = vmatpush3.msra.mxu0 %v621_v45 }
 0x431   :  { %v720_v44 = vmul.f32 %v939_v43, %v929_v20  ;;  %906 = vmatprep.subr.mxu0 %v620_v46 }
 0x432   :  { %735 = vrot.lane.b32.xlu1 %v722_v42, %s1054_s13  ;;  %727 = vrot.lane.b32.xlu0 %v722_v42, %s1056_s3 }
 0x433   :  { %907 = vmatpush3.msra.mxu0 %v620_v46 }
 0x434   :  { %908 = vmatprep.subr.mxu0 %v619_v47 }
 0x435   :  { %909 = vmatpush3.msra.mxu0 %v619_v47 }
 0x436   :  { %725 = vrot.lane.b32.xlu1 %v720_v44, %s1056_s3  ;;  %743 = vrot.lane.b32.xlu0 %v722_v42, %s1057_s24 }
 0x437   :  { %910 = vmatprep.subr.mxu0 %v618_v48 }
 0x438   :  { %911 = vmatpush3.msra.mxu0 %v618_v48 }
 0x43a   :  { %741 = vrot.lane.b32.xlu1 %v720_v44, %s1057_s24  ;;  %733 = vrot.lane.b32.xlu0 %v720_v44, %s1054_s13  ;;  %s1000_s13 = scalar_lea.vmem %s775_s12, 256 }
 0x43b   :  { %p1001_p1 = scmp.ne.s32.totalorder %s775_s12, %s1000_s13  ;;  %p1006_p3 = scmp.lt.s32.totalorder %s1000_s13, %s1000_s13 }
 0x43d   :  { %p1007_p4 = por %p1006_p3, %p1005_p2 }
 0x43f   :  { %p1008_p5 = pnand %p1007_p4, %p1001_p1 }
 0x4a4   :  { %v736_v49 = vpop.permute.xlu1 %735  ;;  %v728_v50 = vpop.permute.xlu0 %727 }
 0x4a5   :  { %v732_v51 = vadd.f32 %v728_v50, %v722_v42 }
 0x4a7   :  { %v740_v52 = vadd.f32 %v736_v49, %v732_v51 }
 0x4a8   :  { %v726_v53 = vpop.permute.xlu1 %725  ;;  %v744_v54 = vpop.permute.xlu0 %743 }
 0x4a9   :  { %v748_v55 = vadd.f32 %v744_v54, %v740_v52  ;;  %v731_v56 = vadd.f32 %v726_v53, %v720_v44 }
 0x4ab   :  { %750 = vrot.lane.b32.xlu0 %v748_v55, %s1058_s11 }
 0x4ac   :  { %v734_v57 = vpop.permute.xlu0 %733  ;;  %v742_v59 = vpop.permute.xlu1 %741 }
 0x4ad   :  { %v739_v58 = vadd.f32 %v734_v57, %v731_v56 }
 0x4af   :  { %v747_v60 = vadd.f32 %v742_v59, %v739_v58 }
 0x4b1   :  { %v753_v61 = vmul.f32 0.25, %v747_v60 }
 0x4b3   :  { %755 = vst.msk [vmem:[#allocation9] sm:$0xff] %vm710_vm3, %v753_v61 }
 0x4ef   :  { %v903_v63 = vpop.f32.mrf.mxu0 }
 0x4f0   :  { %v613_v0 = vadd.f32 %v903_v63, %v806_v62 }
 0x4f1   :  { %v607_v1 = vpop.f32.mrf.mxu0 }
 0x4f2   :  { %v608_v2 = vadd.f32 %v806_v62, %v607_v1  ;;  %v617_v4 = vmax.f32 %v613_v0, 0.0 }
 0x4f4   :  { %v616_v3 = vmax.f32 %v608_v2, 0.0 }
 0x4f6   :  { %912 = vmatprep.mubr.msk.f32.mxu0 %vm274_vm1, %v616_v3 }
 0x4f7   :  { %913 = vmatmul.mubr.msk.f32.vlgmr.msra.gmra.mxu0 %vm274_vm1, %v617_v4 }
 0x51d   :  { %v751_v5 = vpop.permute.xlu0 %750 }
 0x51e   :  { %v754_v6 = vmul.f32 0.25, %v751_v5 }
 0x520   :  { %756 = vst.msk [vmem:[#allocation9 + $0x8] sm:$0xff] %vm710_vm3, %v754_v6 }
 0x521   :  { %1011 = shalt.err (!%p1008_p5)
}
 0x522   :  { %780 = dma.vmem_to_hbm [thread:$0]  %s775_s12, 256, %s1319_s10, [#allocation10], %s1050_s18, %s1050_s18, %s1051_s19  }
 0x523   :  { %v809_v7 = vld [vmem:[%s1315_s6] ss:$0 sm:$0xff]  ;;  %s1060_s16 = smov [#allocation8]  }
 0x524   :  { %s762_s17 = sshll.u32 %s1060_s16, 4  ;;  %s763_s17 = int_to_ptr.vmem [resolvable:$true] %s762_s17 }
 0x525   :  { %s1020_s20 = scalar_lea.vmem %s763_s17, 256  ;;  %p1025_p7 = scmp.lt.s32.totalorder %s763_s17, %s763_s17 }
 0x526   :  { %p1021_p6 = scmp.ne.s32.totalorder %s763_s17, %s1020_s20  ;;  %p1026_p8 = scmp.lt.s32.totalorder %s1020_s20, %s1020_s20 }
 0x528   :  { %p1027_p9 = por %p1026_p8, %p1025_p7 }
 0x52a   :  { %p1028_p10 = pnand %p1027_p9, %p1021_p6 }
 0x5b7   :  { %v914_v8 = vpop.f32.mrf.mxu0 }
 0x5b8   :  { %v707_v9 = vadd.f32 %v914_v8, %v809_v7 }
 0x5b9   :  { %v701_v10 = vpop.f32.mrf.mxu0 }
 0x5ba   :  { %v702_v11 = vadd.f32 %v809_v7, %v701_v10  ;;  %712 = vst.msk [vmem:[#allocation8 + $0x8] sm:$0xff] %vm710_vm3, %v707_v9 }
 0x5bc   :  { %711 = vst.msk [vmem:[#allocation8] sm:$0xff] %vm710_vm3, %v702_v11 }
 0x5bd   :  { %1031 = shalt.err (!%p1028_p10)
}
 0x5be   :  { %768 = dma.vmem_to_hbm [thread:$0]  %s763_s17, 256, %s1318_s9, [#allocation4], %s1050_s18, %s1050_s18, %s1051_s19  }
 0x5bf   :  { %1044 = dma.done.wait [#allocation4], 256  }
 0x5c0   :  { %1045 = vsyncadd [#allocation4], 4294967040 }
 0x5c1   :  { %1046 = dma.done.wait [#allocation10], 256  }
 0x5c2   :  { %1047 = vsyncadd [#allocation10], 4294967040 }
 0x5c3   :  { %787 = vsyncpa [#allocation3], 1 }
 0x5c4   :  { %788 = vsyncpa [#allocation6], 1 }
 0x5c5   :  { %789 = vsyncpa [#allocation4], 1 }
 0x5c6   :  { %790 = vsyncpa [#allocation10], 1 }

</bundles_post_ra>
